<compile_context>
chip_gen: v6e
topology: v6e:2x2x1
jax: 0.10.0
libtpu: 0.0.40
codegen_flags: <defaults>
</compile_context>

<pallas_src>
import functools

import jax
import jax.numpy as jnp
from jax.experimental import pallas as pl
from jax.experimental.pallas import tpu as pltpu


def _round_up(x: int, m: int) -> int:
    return pl.cdiv(x, m) * m


def _choose_tk(d_in: int, tk_max: int):
    """Largest 128-multiple <= tk_max that divides d_in (no K padding).

    Falls back to padding the reduction dim when no such divisor exists.
    Returns (tk, k_pad).
    """
    tk_max = max(128, (tk_max // 128) * 128)
    hi = min(tk_max, _round_up(d_in, 128))
    best = 0
    for t in range(128, hi + 1, 128):
        if d_in % t == 0:
            best = t
    if best:
        return best, d_in
    tk = hi
    return tk, _round_up(d_in, tk)


def clip_classifier_kernel(x_ref, w_enc_ref, w_fc_ref, b_fc_ref, o_ref, acc_ref):
    """Fused: feats = sum_k x[:,k] @ W_enc[k,:] ; logits = feats @ W_fc^T + b.

    Grid = (K_tiles,)  -- the reduction is the ONLY streamed axis, so w_enc is
    read from HBM exactly once and the whole-batch accumulator stays resident.

    x_ref:     (m_pad, tk)            bf16 flattened-pixel tile
    w_enc_ref: (tk, d_emb_pad)        bf16 encode_image stand-in tile (streamed)
    w_fc_ref:  (d_emb_pad, c_pad)     bf16 fc weight, pre-transposed + padded
    b_fc_ref:  (1, c_pad)             f32 fc bias, lane-padded
    o_ref:     (m_pad, c_pad)         f32 logits (resident across the grid)
    acc_ref:   (m_pad, d_emb_pad)     f32 feature accumulator (VMEM scratch)
    """
    k = pl.program_id(0)

    @pl.when(k == 0)
    def _():
        acc_ref[...] = jnp.zeros_like(acc_ref)

    # bf16 x bf16 -> f32 accumulate on the MXU.
    acc_ref[...] += jnp.dot(x_ref[...], w_enc_ref[...],
                            preferred_element_type=jnp.float32)

    @pl.when(k == pl.num_programs(0) - 1)
    def _():
        # Tiny fc head: bf16 x bf16 on the MXU, f32 accumulation, bias folded in.
        feats = acc_ref[...].astype(jnp.bfloat16)
        logits = jnp.dot(feats, w_fc_ref[...],
                         preferred_element_type=jnp.float32) + b_fc_ref[...]
        o_ref[...] = logits.astype(o_ref.dtype)


def prepare_clip_params(w_enc, w_fc, b_fc, *, tk_max=2048):
    """One-time (outside the jitted forward) padding + casting of the weights.

    w_enc: (D_in, D_emb)   encode_image stand-in projection
    w_fc:  (C, D_emb)      nn.Linear weight layout (PyTorch)
    b_fc:  (C,)            nn.Linear bias

    Returns ((w_enc_p, w_fc_t, b_fc_p), meta) with meta holding static ints.
    """
    d_in, d_emb = w_enc.shape
    num_classes = w_fc.shape[0]

    tk, k_pad = _choose_tk(d_in, tk_max)
    d_emb_pad = _round_up(max(d_emb, 128), 128)      # lane-dense feature dim
    c_pad = _round_up(max(num_classes, 128), 128)    # lane-dense output dim

    w_enc_p = jnp.zeros((k_pad, d_emb_pad), jnp.bfloat16)
    w_enc_p = w_enc_p.at[:d_in, :d_emb].set(w_enc.astype(jnp.bfloat16))

    # fc weight pre-transposed to (D_emb_pad, C_pad), held in bf16.
    w_fc_t = jnp.zeros((d_emb_pad, c_pad), jnp.bfloat16)
    w_fc_t = w_fc_t.at[:d_emb, :num_classes].set(w_fc.T.astype(jnp.bfloat16))

    b_fc_p = jnp.zeros((1, c_pad), jnp.float32)
    b_fc_p = b_fc_p.at[:, :num_classes].set(b_fc.astype(jnp.float32))

    meta = dict(tk=tk, num_classes=num_classes)
    return (w_enc_p, w_fc_t, b_fc_p), meta


@functools.partial(jax.jit, static_argnames=("tk", "num_classes"))
def clip_image_classifier_forward(x_nchw, w_enc_p, w_fc_t, b_fc_p, *, tk,
                                  num_classes):
    """Forward pass. Weights must come from prepare_clip_params()."""
    B = x_nchw.shape[0]
    d_in = x_nchw.shape[1] * x_nchw.shape[2] * x_nchw.shape[3]
    k_pad, d_emb_pad = w_enc_p.shape
    c_pad = w_fc_t.shape[1]

    # Whole batch as a single M tile: accumulator (m_pad x d_emb_pad) f32 is
    # < 1 MiB for B <= 256, d_emb <= 1024, so it comfortably stays in VMEM.
    # TODO(synk): for very large batches (B >> 1024) this would need an extra
    # M loop; not required for this module's fine-tuning use case.
    m_pad = _round_up(max(B, 16), 16)    # bf16 sublane packing = 16 rows

    # Flatten + cast x (activation work that has to happen per call anyway);
    # pad only when needed. K padding is usually avoided by _choose_tk.
    x_flat = x_nchw.reshape(B, d_in).astype(jnp.bfloat16)
    if (m_pad, k_pad) == (B, d_in):
        x_p = x_flat
    else:
        x_p = jnp.zeros((m_pad, k_pad), jnp.bfloat16).at[:B, :d_in].set(x_flat)

    k_steps = k_pad // tk

    # Triple-buffer the streamed weight when the K loop is long enough.
    w_enc_pipeline = pl.Buffered(3) if k_steps >= 3 else pl.Buffered(2)
    n_wenc_buf = 3 if k_steps >= 3 else 2

    # VMEM budget from the actual footprint, capped for v7x's 64 MiB VMEM.
    vmem_bytes = (2 * m_pad * tk * 2                    # x double buffer (bf16)
                  + n_wenc_buf * tk * d_emb_pad * 2     # w_enc buffers (bf16)
                  + 2 * d_emb_pad * c_pad * 2           # w_fc (bf16)
                  + 2 * c_pad * 4                       # bias
                  + 2 * m_pad * c_pad * 4               # logits out
                  + m_pad * d_emb_pad * 4)              # f32 accumulator
    vmem_limit = int(min(max(vmem_bytes * 3 // 2 + (4 << 20), 16 << 20),
                         48 << 20))

    cost = pl.CostEstimate(
        flops=2 * m_pad * k_pad * d_emb_pad + 2 * m_pad * d_emb_pad * c_pad,
        transcendentals=0,
        bytes_accessed=(m_pad * k_pad * 2            # x (bf16), read once
                        + k_pad * d_emb_pad * 2      # w_enc (bf16), read once
                        + d_emb_pad * c_pad * 2      # w_fc (bf16)
                        + c_pad * 4                  # bias
                        + m_pad * c_pad * 4))        # logits out

    out = pl.pallas_call(
        clip_classifier_kernel,
        out_shape=jax.ShapeDtypeStruct((m_pad, c_pad), jnp.float32),
        grid_spec=pltpu.PrefetchScalarGridSpec(
            num_scalar_prefetch=0,
            grid=(k_steps,),
            in_specs=[
                pl.BlockSpec((m_pad, tk), lambda k: (0, k)),        # x tile
                pl.BlockSpec((tk, d_emb_pad), lambda k: (k, 0),     # w_enc tile
                             pipeline_mode=w_enc_pipeline),
                pl.BlockSpec((d_emb_pad, c_pad), lambda k: (0, 0)),  # w_fc
                pl.BlockSpec((1, c_pad), lambda k: (0, 0)),          # bias
            ],
            out_specs=pl.BlockSpec((m_pad, c_pad), lambda k: (0, 0)),
            scratch_shapes=[pltpu.VMEM((m_pad, d_emb_pad), jnp.float32)],
        ),
        compiler_params=pltpu.CompilerParams(
            dimension_semantics=("arbitrary",),   # K is a reduction axis
            vmem_limit_bytes=vmem_limit,
        ),
        cost_estimate=cost,
    )(x_p, w_enc_p, w_fc_t, b_fc_p)

    # Strip batch / lane padding.
    return out[:B, :num_classes]


if __name__ == "__main__":
    # Small shapes consistent with the module's forward:
    #   image: (B, C, H, W) = (2, 4, 16, 16)  -> flattened D_in = 1024
    #   pretrained.visual.output_dim = 32
    #   num_classes = 8
    B, C, H, W = 2, 4, 16, 16
    D_in = C * H * W
    D_emb = 32          # pretrained.visual.output_dim
    num_classes = 8

    key = jax.random.PRNGKey(0)
    k_x, k_enc, k_w, k_b = jax.random.split(key, 4)

    x = jax.random.normal(k_x, (B, C, H, W), dtype=jnp.float32)
    w_enc = jax.random.normal(k_enc, (D_in, D_emb), dtype=jnp.float32) * 0.02
    # nn.Linear(output_dim, num_classes): weight (C, output_dim), bias (C,)
    w_fc = jax.random.normal(k_w, (num_classes, D_emb), dtype=jnp.float32) * 0.1
    b_fc = jax.random.normal(k_b, (num_classes,), dtype=jnp.float32) * 0.1

    # Pure-JAX reference with the same bf16 quantization as the kernel.
    x_bf = x.reshape(B, D_in).astype(jnp.bfloat16).astype(jnp.float32)
    w_bf = w_enc.astype(jnp.bfloat16).astype(jnp.float32)
    feats = (x_bf @ w_bf).astype(jnp.bfloat16).astype(jnp.float32)
    w_fc_bf = w_fc.astype(jnp.bfloat16).astype(jnp.float32)
    ref = feats @ w_fc_bf.T + b_fc

    # Run 1: default tk_max (single K step -> init + epilogue fire together).
    (params_1, meta_1) = prepare_clip_params(w_enc, w_fc, b_fc, tk_max=2048)
    logits_1 = clip_image_classifier_forward(x, *params_1, **meta_1)
    logits_1 = jax.block_until_ready(logits_1)
    assert logits_1.shape == (B, num_classes)
    assert jnp.allclose(logits_1, ref, atol=2e-2, rtol=2e-2), (
        float(jnp.max(jnp.abs(logits_1 - ref))))

    # Run 2: tk_max=256 -> 4-step K reduction, exercises the accumulator loop
    # and the Buffered(3) w_enc stream.
    (params_2, meta_2) = prepare_clip_params(w_enc, w_fc, b_fc, tk_max=256)
    logits_2 = clip_image_classifier_forward(x, *params_2, **meta_2)
    logits_2 = jax.block_until_ready(logits_2)
    assert logits_2.shape == (B, num_classes)
    assert jnp.allclose(logits_2, ref, atol=2e-2, rtol=2e-2), (
        float(jnp.max(jnp.abs(logits_2 - ref))))

    print("KERNEL_OK")
</pallas_src>

<mosaic_0001>
module attributes {stable_mosaic.version = 11 : i64} {
  func.func @clip_classifier_kernel(%arg0: i32, %arg1: memref<16x1024xbf16, #tpu.memory_space<vmem>>, %arg2: memref<1024x128xbf16, #tpu.memory_space<vmem>>, %arg3: memref<128x128xbf16, #tpu.memory_space<vmem>>, %arg4: memref<1x128xf32, #tpu.memory_space<vmem>>, %arg5: memref<16x128xf32, #tpu.memory_space<vmem>>, %arg6: memref<16x128xf32, #tpu.memory_space<vmem>>) attributes {dimension_semantics = [#tpu.dimension_semantics<arbitrary>], iteration_bounds = array<i64: 1>, scalar_prefetch = 0 : i64, scratch_operands = 1 : i64, tpu.core_type = #tpu.core_type<tc>, window_params = [{transform_indices = @transform_0, window_bounds = array<i64: 16, 1024>}, {pipeline_mode = #tpu.pipeline_mode<double_buffered>, transform_indices = @transform_1, window_bounds = array<i64: 1024, 128>}, {pipeline_mode = #tpu.pipeline_mode<synchronous>, transform_indices = @transform_2, window_bounds = array<i64: 128, 128>}, {pipeline_mode = #tpu.pipeline_mode<synchronous>, transform_indices = @transform_3, window_bounds = array<i64: 1, 128>}, {pipeline_mode = #tpu.pipeline_mode<synchronous>, transform_indices = @transform_4, window_bounds = array<i64: 16, 128>}]} {
    %c0_i32 = arith.constant 0 : i32
    %0 = arith.cmpi eq, %arg0, %c0_i32 : i32
    %1 = arith.extui %0 : i1 to i32
    %c0_i32_0 = arith.constant 0 : i32
    %2 = arith.cmpi ne, %1, %c0_i32_0 : i32
    scf.if %2 {
      %cst_10 = arith.constant 0.000000e+00 : f32
      %12 = vector.broadcast %cst_10 : f32 to vector<16x128xf32>
      %c0_11 = arith.constant 0 : index
      %c0_12 = arith.constant 0 : index
      %13 = vector.load %arg6[%c0_11, %c0_12] : memref<16x128xf32, #tpu.memory_space<vmem>>, vector<16x128xf32>
      tpu.vector_store %arg6[%c0_11, %c0_12], %12 {strides = array<i32>} : memref<16x128xf32, #tpu.memory_space<vmem>>, vector<16x128xf32>,
    } else {
    }
    %c0 = arith.constant 0 : index
    %c0_1 = arith.constant 0 : index
    %3 = vector.load %arg6[%c0, %c0_1] : memref<16x128xf32, #tpu.memory_space<vmem>>, vector<16x128xf32>
    %c0_2 = arith.constant 0 : index
    %c0_3 = arith.constant 0 : index
    %4 = vector.load %arg1[%c0_2, %c0_3] : memref<16x1024xbf16, #tpu.memory_space<vmem>>, vector<16x1024xbf16>
    %c0_4 = arith.constant 0 : index
    %c0_5 = arith.constant 0 : index
    %5 = vector.load %arg2[%c0_4, %c0_5] : memref<1024x128xbf16, #tpu.memory_space<vmem>>, vector<1024x128xbf16>
    %cst = arith.constant dense<0.000000e+00> : vector<16x128xf32>
    %6 = tpu.matmul %4, %5, %cst {dimension_numbers = #tpu.dot_dimension_numbers<[1], [0], [0], [1], [0, 0, 1, 1], [], []>} : vector<16x1024xbf16>, vector<1024x128xbf16>, vector<16x128xf32> -> vector<16x128xf32>
    %7 = arith.addf %3, %6 : vector<16x128xf32>
    %c0_6 = arith.constant 0 : index
    %c0_7 = arith.constant 0 : index
    %8 = vector.load %arg6[%c0_6, %c0_7] : memref<16x128xf32, #tpu.memory_space<vmem>>, vector<16x128xf32>
    tpu.vector_store %arg6[%c0_6, %c0_7], %7 {strides = array<i32>} : memref<16x128xf32, #tpu.memory_space<vmem>>, vector<16x128xf32>,
    %c0_i32_8 = arith.constant 0 : i32
    %9 = arith.cmpi eq, %arg0, %c0_i32_8 : i32
    %10 = arith.extui %9 : i1 to i32
    %c0_i32_9 = arith.constant 0 : i32
    %11 = arith.cmpi ne, %10, %c0_i32_9 : i32
    scf.if %11 {
      %c0_10 = arith.constant 0 : index
      %c0_11 = arith.constant 0 : index
      %12 = vector.load %arg6[%c0_10, %c0_11] : memref<16x128xf32, #tpu.memory_space<vmem>>, vector<16x128xf32>
      %13 = arith.truncf %12 : vector<16x128xf32> to vector<16x128xbf16>
      %c0_12 = arith.constant 0 : index
      %c0_13 = arith.constant 0 : index
      %14 = vector.load %arg3[%c0_12, %c0_13] : memref<128x128xbf16, #tpu.memory_space<vmem>>, vector<128x128xbf16>
      %cst_14 = arith.constant dense<0.000000e+00> : vector<16x128xf32>
      %15 = tpu.matmul %13, %14, %cst_14 {dimension_numbers = #tpu.dot_dimension_numbers<[1], [0], [0], [1], [0, 0, 1, 1], [], []>} : vector<16x128xbf16>, vector<128x128xbf16>, vector<16x128xf32> -> vector<16x128xf32>
      %c0_15 = arith.constant 0 : index
      %c0_16 = arith.constant 0 : index
      %16 = vector.load %arg4[%c0_15, %c0_16] : memref<1x128xf32, #tpu.memory_space<vmem>>, vector<1x128xf32>
      %17 = vector.broadcast %16 : vector<1x128xf32> to vector<16x128xf32>
      %18 = arith.addf %15, %17 : vector<16x128xf32>
      %c0_17 = arith.constant 0 : index
      %c0_18 = arith.constant 0 : index
      %19 = vector.load %arg5[%c0_17, %c0_18] : memref<16x128xf32, #tpu.memory_space<vmem>>, vector<16x128xf32>
      tpu.vector_store %arg5[%c0_17, %c0_18], %18 {strides = array<i32>} : memref<16x128xf32, #tpu.memory_space<vmem>>, vector<16x128xf32>,
    } else {
    }
    return
  }
  func.func @transform_0(%arg0: i32) -> (i32, i32) {
    %c0_i32 = arith.constant 0 : i32
    %c0_i32_0 = arith.constant 0 : i32
    return %c0_i32, %arg0 : i32, i32
  }
  func.func @transform_1(%arg0: i32) -> (i32, i32) {
    %c0_i32 = arith.constant 0 : i32
    %c0_i32_0 = arith.constant 0 : i32
    return %arg0, %c0_i32 : i32, i32
  }
  func.func @transform_2(%arg0: i32) -> (i32, i32) {
    %c0_i32 = arith.constant 0 : i32
    %c0_i32_0 = arith.constant 0 : i32
    %c0_i32_1 = arith.constant 0 : i32
    return %c0_i32, %c0_i32_0 : i32, i32
  }
  func.func @transform_3(%arg0: i32) -> (i32, i32) {
    %c0_i32 = arith.constant 0 : i32
    %c0_i32_0 = arith.constant 0 : i32
    %c0_i32_1 = arith.constant 0 : i32
    return %c0_i32, %c0_i32_0 : i32, i32
  }
  func.func @transform_4(%arg0: i32) -> (i32, i32) {
    %c0_i32 = arith.constant 0 : i32
    %c0_i32_0 = arith.constant 0 : i32
    %c0_i32_1 = arith.constant 0 : i32
    return %c0_i32, %c0_i32_0 : i32, i32
  }
}

</mosaic_0001>

<bundles_post_ra>
// kernel: clip_image_classifier_forward.1
= control target key start
LH: loop header
LB: loop body
LE: loop exit
PB: predicated region body
PF: predicated region fallthrough
CT: control target
= control target key end

     0   :  { %9 = vsyncpa [#allocation4], 0  ;;  %s1190_s15 = smov [#allocation3]   ;;  %s1280_s0 = inlined_call_operand.vmem [shape: bf16[16,1024], index: 0, kind: input, shape index: {}]   ;;  %s1281_s1 = inlined_call_operand.hbm [shape: bf16[1024,128], index: 1, kind: input, shape index: {}]   ;;  %s1282_s2 = inlined_call_operand.vmem [shape: bf16[128,128], index: 2, kind: input, shape index: {}]   ;;  %s1283_s3 = inlined_call_operand.vmem [shape: f32[1,128], index: 3, kind: input, shape index: {}]   ;;  %s1284_s4 = inlined_call_operand.vmem [shape: f32[16,128], index: 4, kind: output, shape index: {}]  }
   0x1   :  { %s17_s16 = sshll.u32 %s1190_s15, 4  ;;  %s18_s16 = int_to_ptr.vmem [resolvable:$true] %s17_s16 }
   0x2   :  { %s1176_s17 = scalar_lea.vmem %s18_s16, 8192  ;;  %p1181_p1 = scmp.lt.s32.totalorder %s18_s16, %s18_s16 }
   0x3   :  { %p1177_p0 = scmp.ne.s32.totalorder %s18_s16, %s1176_s17  ;;  %p1182_p2 = scmp.lt.s32.totalorder %s1176_s17, %s1176_s17 }
   0x5   :  { %p1183_p3 = por %p1182_p2, %p1181_p1 }
   0x7   :  { %p1184_p4 = pnand %p1183_p3, %p1177_p0 }
   0x9   :  { %1187 = shalt.err (!%p1184_p4)
}
   0xa   :  { %s1191_s18 = smov 64   ;;  %s1192_s19 = smov 4  }
   0xb   :  { %23 = dma.hbm_to_vmem [thread:$0]  %s1281_s1, 8192, %s18_s16, [#allocation4], %s1191_s18, %s1191_s18, %s1192_s19  }
   0xc   :  { %1188 = dma.done.wait [#allocation4], 8192  }
   0xd   :  { %1189 = vsyncadd [#allocation4], 4294959104  ;;  %v1096_v0 = vld [vmem:[#allocation3 + $0x78] sm:$0xff]   ;;  %v1100_v4 = vld [vmem:[#allocation3 + $0x70] sm:$0xff]   ;;  %vm1194_vm0 = vmmov 0  }
   0xe   :  { %v1097_v1 = vld [vmem:[#allocation3 + $0xf8] sm:$0xff]   ;;  %974 = vmatprep.subr.bf16.mxu0 %v1096_v0  ;;  %v1101_v5 = vld [vmem:[#allocation3 + $0xf0] sm:$0xff]   ;;  %v1104_v8 = vld [vmem:[#allocation3 + $0x68] sm:$0xff]  }
   0xf   :  { %v1098_v2 = vld [vmem:[#allocation3 + $0x38] sm:$0xff]   ;;  %996 = vmatprep.subr.bf16.mxu1 %v1097_v1  ;;  %v1102_v6 = vld [vmem:[#allocation3 + $0x30] sm:$0xff]   ;;  %v1105_v9 = vld [vmem:[#allocation3 + $0xe8] sm:$0xff]  }
  0x10   :  { %v1099_v3 = vld [vmem:[#allocation3 + $0xb8] sm:$0xff]   ;;  %975 = vmatpush3.bf16.msra.mxu0 %v1098_v2  ;;  %v1103_v7 = vld [vmem:[#allocation3 + $0xb0] sm:$0xff]   ;;  %v1106_v10 = vld [vmem:[#allocation3 + $0x28] sm:$0xff]  }
  0x11   :  { %997 = vmatpush3.bf16.msra.mxu1 %v1099_v3  ;;  %976 = vmatprep.subr.bf16.mxu0 %v1100_v4  ;;  %v1107_v11 = vld [vmem:[#allocation3 + $0xa8] sm:$0xff]   ;;  %v1108_v12 = vld [vmem:[#allocation3 + $0x60] sm:$0xff]   ;;  %v1112_v16 = vld [vmem:[#allocation3 + $0x58] sm:$0xff]  }
  0x12   :  { %998 = vmatprep.subr.bf16.mxu1 %v1101_v5  ;;  %v1109_v13 = vld [vmem:[#allocation3 + $0xe0] sm:$0xff]   ;;  %v1113_v17 = vld [vmem:[#allocation3 + $0xd8] sm:$0xff]   ;;  %v1116_v20 = vld [vmem:[#allocation3 + $0x50] sm:$0xff]  }
  0x13   :  { %v1110_v14 = vld [vmem:[#allocation3 + $0x20] sm:$0xff]   ;;  %v1114_v18 = vld [vmem:[#allocation3 + $0x18] sm:$0xff]   ;;  %v1117_v21 = vld [vmem:[#allocation3 + $0xd0] sm:$0xff]  }
  0x14   :  { %977 = vmatpush3.bf16.msra.mxu0 %v1102_v6  ;;  %v1111_v15 = vld [vmem:[#allocation3 + $0xa0] sm:$0xff]   ;;  %v1115_v19 = vld [vmem:[#allocation3 + $0x98] sm:$0xff]   ;;  %v1118_v22 = vld [vmem:[#allocation3 + $0x10] sm:$0xff]  }
  0x15   :  { %999 = vmatpush3.bf16.msra.mxu1 %v1103_v7  ;;  %978 = vmatprep.subr.bf16.mxu0 %v1104_v8  ;;  %v1119_v23 = vld [vmem:[#allocation3 + $0x90] sm:$0xff]   ;;  %v1120_v24 = vld [vmem:[#allocation3 + $0x48] sm:$0xff]   ;;  %v1124_v28 = vld [vmem:[#allocation3 + $0x40] sm:$0xff]  }
  0x16   :  { %1000 = vmatprep.subr.bf16.mxu1 %v1105_v9  ;;  %v1121_v25 = vld [vmem:[#allocation3 + $0xc8] sm:$0xff]   ;;  %v1125_v29 = vld [vmem:[#allocation3 + $0xc0] sm:$0xff]   ;;  %v1128_v40 = vld [vmem:[#allocation3 + $0x178] sm:$0xff]  }
  0x17   :  { %v1122_v26 = vld [vmem:[#allocation3 + $0x8] sm:$0xff]   ;;  %v1126_v30 = vld [vmem:[#allocation3] sm:$0xff]   ;;  %v1129_v41 = vld [vmem:[#allocation3 + $0x1f8] sm:$0xff]  }
  0x18   :  { %979 = vmatpush3.bf16.msra.mxu0 %v1106_v10  ;;  %v1123_v27 = vld [vmem:[#allocation3 + $0x88] sm:$0xff]   ;;  %v1127_v31 = vld [vmem:[#allocation3 + $0x80] sm:$0xff]   ;;  %v1130_v42 = vld [vmem:[#allocation3 + $0x138] sm:$0xff]  }
  0x19   :  { %1001 = vmatpush3.bf16.msra.mxu1 %v1107_v11  ;;  %980 = vmatprep.subr.bf16.mxu0 %v1108_v12  ;;  %v40_v32 = vld [vmem:[%s1280_s0] sm:$0xff]  ;;  %v41_v34 = vld [vmem:[%s1280_s0 + $0x8] sm:$0xff]  ;;  %v1131_v43 = vld [vmem:[#allocation3 + $0x1b8] sm:$0xff]  }
  0x1a   :  { %1002 = vmatprep.subr.bf16.mxu1 %v1109_v13  ;;  %v44_v33 = vld [vmem:[%s1280_s0 + $0x20] sm:$0xff]  ;;  %v45_v37 = vld [vmem:[%s1280_s0 + $0x28] sm:$0xff]  ;;  %v1132_v44 = vld [vmem:[#allocation3 + $0x170] sm:$0xff]  }
  0x1b   :  { %v893_v35 = vcombine.low %v40_v32, %v44_v33  ;;  %v894_v36 = vcombine.high %v40_v32, %v44_v33  ;;  %v895_v38 = vcombine.low %v41_v34, %v45_v37  ;;  %v896_v39 = vcombine.high %v41_v34, %v45_v37  ;;  %v1133_v45 = vld [vmem:[#allocation3 + $0x1f0] sm:$0xff]   ;;  %v1136_v48 = vld [vmem:[#allocation3 + $0x168] sm:$0xff]   ;;  %v1140_v52 = vld [vmem:[#allocation3 + $0x160] sm:$0xff]  }
  0x1c   :  { %981 = vmatpush3.bf16.msra.mxu0 %v1110_v14  ;;  %v1134_v46 = vld [vmem:[#allocation3 + $0x130] sm:$0xff]   ;;  %v1137_v49 = vld [vmem:[#allocation3 + $0x1e8] sm:$0xff]   ;;  %v1141_v53 = vld [vmem:[#allocation3 + $0x1e0] sm:$0xff]  }
  0x1d   :  { %1003 = vmatpush3.bf16.msra.mxu1 %v1111_v15  ;;  %982 = vmatprep.subr.bf16.mxu0 %v1112_v16  ;;  %v1135_v47 = vld [vmem:[#allocation3 + $0x1b0] sm:$0xff]   ;;  %v1138_v50 = vld [vmem:[#allocation3 + $0x128] sm:$0xff]   ;;  %v1142_v54 = vld [vmem:[#allocation3 + $0x120] sm:$0xff]  }
  0x1e   :  { %1004 = vmatprep.subr.bf16.mxu1 %v1113_v17  ;;  %632 = vmatprep.mubr.bf16.mxu0 %v894_v36  ;;  %v1139_v51 = vld [vmem:[#allocation3 + $0x1a8] sm:$0xff]   ;;  %v1143_v55 = vld [vmem:[#allocation3 + $0x1a0] sm:$0xff]   ;;  %v1144_v56 = vld [vmem:[#allocation3 + $0x158] sm:$0xff]   ;;  %v1193_v17 = vmov 0.0  }
  0x1f   :  { %673 = vmatprep.mubr.bf16.mxu1 %v896_v39  ;;  %v1145_v57 = vld [vmem:[#allocation3 + $0x1d8] sm:$0xff]   ;;  %v1148_v60 = vld [vmem:[#allocation3 + $0x150] sm:$0xff]   ;;  %v1152_v0 = vld [vmem:[#allocation3 + $0x148] sm:$0xff]  }
  0x20   :  { %983 = vmatpush3.bf16.msra.mxu0 %v1114_v18  ;;  %v1146_v58 = vld [vmem:[#allocation3 + $0x118] sm:$0xff]   ;;  %v1149_v61 = vld [vmem:[#allocation3 + $0x1d0] sm:$0xff]   ;;  %v1153_v1 = vld [vmem:[#allocation3 + $0x1c8] sm:$0xff]  }
  0x21   :  { %1005 = vmatpush3.bf16.msra.mxu1 %v1115_v19  ;;  %984 = vmatprep.subr.bf16.mxu0 %v1116_v20  ;;  %v1147_v59 = vld [vmem:[#allocation3 + $0x198] sm:$0xff]   ;;  %v1150_v62 = vld [vmem:[#allocation3 + $0x110] sm:$0xff]   ;;  %v1154_v2 = vld [vmem:[#allocation3 + $0x108] sm:$0xff]  }
  0x22   :  { %1006 = vmatprep.subr.bf16.mxu1 %v1117_v21  ;;  %v1151_v63 = vld [vmem:[#allocation3 + $0x190] sm:$0xff]   ;;  %v1155_v3 = vld [vmem:[#allocation3 + $0x188] sm:$0xff]   ;;  %v1156_v4 = vld [vmem:[#allocation3 + $0x140] sm:$0xff]  }
  0x23   :  { %v1157_v5 = vld [vmem:[#allocation3 + $0x1c0] sm:$0xff]   ;;  %v42_v8 = vld [vmem:[%s1280_s0 + $0x10] sm:$0xff]  ;;  %v43_v12 = vld [vmem:[%s1280_s0 + $0x18] sm:$0xff] }
  0x24   :  { %985 = vmatpush3.bf16.msra.mxu0 %v1118_v22  ;;  %v1158_v6 = vld [vmem:[#allocation3 + $0x100] sm:$0xff]   ;;  %v46_v9 = vld [vmem:[%s1280_s0 + $0x30] sm:$0xff]  ;;  %v47_v13 = vld [vmem:[%s1280_s0 + $0x38] sm:$0xff] }
  0x25   :  { %1007 = vmatpush3.bf16.msra.mxu1 %v1119_v23  ;;  %986 = vmatprep.subr.bf16.mxu0 %v1120_v24  ;;  %v1159_v7 = vld [vmem:[#allocation3 + $0x180] sm:$0xff]   ;;  %v897_v10 = vcombine.low %v42_v8, %v46_v9  ;;  %v898_v11 = vcombine.high %v42_v8, %v46_v9  ;;  %v899_v14 = vcombine.low %v43_v12, %v47_v13  ;;  %v1160_v16 = vld [vmem:[%s1282_s2 + $0x38] sm:$0xff]   ;;  %v1161_v18 = vld [vmem:[%s1282_s2 + $0x30] sm:$0xff]  }
  0x26   :  { %1008 = vmatprep.subr.bf16.mxu1 %v1121_v25  ;;  %v900_v15 = vcombine.high %v43_v12, %v47_v13  ;;  %v1162_v19 = vld [vmem:[%s1282_s2 + $0x28] sm:$0xff]   ;;  %v1163_v20 = vld [vmem:[%s1282_s2 + $0x20] sm:$0xff]   ;;  %v1164_v21 = vld [vmem:[%s1282_s2 + $0x18] sm:$0xff]  }
  0x27   :  { %v1165_v22 = vld [vmem:[%s1282_s2 + $0x10] sm:$0xff]   ;;  %v1166_v23 = vld [vmem:[%s1282_s2 + $0x8] sm:$0xff]   ;;  %v1167_v24 = vld [vmem:[%s1282_s2] sm:$0xff]  }
  0x28   :  { %987 = vmatpush3.bf16.msra.mxu0 %v1122_v26 }
  0x29   :  { %1009 = vmatpush3.bf16.msra.mxu1 %v1123_v27  ;;  %988 = vmatprep.subr.bf16.mxu0 %v1124_v28 }
  0x2a   :  { %1010 = vmatprep.subr.bf16.mxu1 %v1125_v29 }
  0x2c   :  { %989 = vmatpush3.bf16.msra.mxu0 %v1126_v30 }
  0x2d   :  { %1011 = vmatpush3.bf16.msra.mxu1 %v1127_v31  ;;  %1018 = vmatprep.subr.bf16.mxu0 %v1128_v40 }
  0x2e   :  { %1040 = vmatprep.subr.bf16.mxu1 %v1129_v41 }
  0x2f   :  { %633 = vmatmul.mubr.bf16.vlgmr.msra.gmra.mxu0 %v893_v35 }
  0x30   :  { %674 = vmatmul.mubr.bf16.vlgmr.msra.gmra.mxu1 %v895_v38  ;;  %1019 = vmatpush3.bf16.msra.mxu0 %v1130_v42 }
  0x31   :  { %1041 = vmatpush3.bf16.msra.mxu1 %v1131_v43  ;;  %1020 = vmatprep.subr.bf16.mxu0 %v1132_v44 }
  0x32   :  { %1042 = vmatprep.subr.bf16.mxu1 %v1133_v45  ;;  %714 = vmatprep.mubr.bf16.mxu0 %v898_v11 }
  0x33   :  { %755 = vmatprep.mubr.bf16.mxu1 %v900_v15 }
  0x34   :  { %1021 = vmatpush3.bf16.msra.mxu0 %v1134_v46 }
  0x35   :  { %1043 = vmatpush3.bf16.msra.mxu1 %v1135_v47  ;;  %1022 = vmatprep.subr.bf16.mxu0 %v1136_v48 }
  0x36   :  { %1044 = vmatprep.subr.bf16.mxu1 %v1137_v49 }
  0x38   :  { %1023 = vmatpush3.bf16.msra.mxu0 %v1138_v50 }
  0x39   :  { %1045 = vmatpush3.bf16.msra.mxu1 %v1139_v51  ;;  %1024 = vmatprep.subr.bf16.mxu0 %v1140_v52 }
  0x3a   :  { %1046 = vmatprep.subr.bf16.mxu1 %v1141_v53 }
  0x3c   :  { %1025 = vmatpush3.bf16.msra.mxu0 %v1142_v54 }
  0x3d   :  { %1047 = vmatpush3.bf16.msra.mxu1 %v1143_v55  ;;  %1026 = vmatprep.subr.bf16.mxu0 %v1144_v56  ;;  %v965_v56 = vld [vmem:[%s1283_s3] ss:$0 sm:$0xff] }
  0x3e   :  { %1048 = vmatprep.subr.bf16.mxu1 %v1145_v57 }
  0x40   :  { %1027 = vmatpush3.bf16.msra.mxu0 %v1146_v58 }
  0x41   :  { %1049 = vmatpush3.bf16.msra.mxu1 %v1147_v59  ;;  %1028 = vmatprep.subr.bf16.mxu0 %v1148_v60 }
  0x42   :  { %1050 = vmatprep.subr.bf16.mxu1 %v1149_v61 }
  0x44   :  { %1029 = vmatpush3.bf16.msra.mxu0 %v1150_v62 }
  0x45   :  { %1051 = vmatpush3.bf16.msra.mxu1 %v1151_v63  ;;  %1030 = vmatprep.subr.bf16.mxu0 %v1152_v0 }
  0x46   :  { %1052 = vmatprep.subr.bf16.mxu1 %v1153_v1 }
  0x48   :  { %1031 = vmatpush3.bf16.msra.mxu0 %v1154_v2 }
  0x49   :  { %1053 = vmatpush3.bf16.msra.mxu1 %v1155_v3  ;;  %1032 = vmatprep.subr.bf16.mxu0 %v1156_v4 }
  0x4a   :  { %1054 = vmatprep.subr.bf16.mxu1 %v1157_v5 }
  0x4c   :  { %1033 = vmatpush3.bf16.msra.mxu0 %v1158_v6 }
  0x4d   :  { %1055 = vmatpush3.bf16.msra.mxu1 %v1159_v7  ;;  %1071 = vmatprep.subr.bf16.mxu0 %v1193_v17 }
  0x4f   :  { %715 = vmatmul.mubr.bf16.vlgmr.msra.gmra.mxu0 %v897_v10 }
  0x50   :  { %756 = vmatmul.mubr.bf16.vlgmr.msra.gmra.mxu1 %v899_v14  ;;  %1072 = vmatpush3.bf16.msra.mxu0 %v1160_v16 }
  0x51   :  { %1073 = vmatprep.subr.bf16.mxu0 %v1193_v17  ;;  %1087 = vmatprep.mubr.msk.bf16.mxu0 %vm1194_vm0, %v1193_v17 }
  0x54   :  { %1074 = vmatpush3.bf16.msra.mxu0 %v1161_v18 }
  0x55   :  { %1075 = vmatprep.subr.bf16.mxu0 %v1193_v17 }
  0x58   :  { %1076 = vmatpush3.bf16.msra.mxu0 %v1162_v19 }
  0x59   :  { %1077 = vmatprep.subr.bf16.mxu0 %v1193_v17 }
  0x5c   :  { %1078 = vmatpush3.bf16.msra.mxu0 %v1163_v20 }
  0x5d   :  { %1079 = vmatprep.subr.bf16.mxu0 %v1193_v17 }
  0x60   :  { %1080 = vmatpush3.bf16.msra.mxu0 %v1164_v21 }
  0x61   :  { %1081 = vmatprep.subr.bf16.mxu0 %v1193_v17 }
  0x64   :  { %1082 = vmatpush3.bf16.msra.mxu0 %v1165_v22 }
  0x65   :  { %1083 = vmatprep.subr.bf16.mxu0 %v1193_v17 }
  0x68   :  { %1084 = vmatpush3.bf16.msra.mxu0 %v1166_v23 }
  0x69   :  { %1085 = vmatprep.subr.bf16.mxu0 %v1193_v17 }
  0x6c   :  { %1086 = vmatpush3.bf16.msra.mxu0 %v1167_v24 }
  0xef   :  { %v990_v25 = vpop.f32.mrf.mxu0 }
  0xf0   :  { %v1012_v26 = vpop.f32.mrf.mxu1 }
  0xf1   :  { %v991_v27 = vpop.f32.mrf.mxu0 }
  0xf2   :  { %v1013_v28 = vpop.f32.mrf.mxu1  ;;  %v992_v34 = vadd.f32 %v991_v27, %v990_v25 }
  0xf3   :  { %v993_v29 = vpop.f32.mrf.mxu0  ;;  %v1014_v35 = vadd.f32 %v1013_v28, %v1012_v26 }
  0xf4   :  { %v1015_v30 = vpop.f32.mrf.mxu1 }
  0xf5   :  { %v994_v31 = vpop.f32.mrf.mxu0  ;;  %v676_v43 = vadd.f32 %v1014_v35, %v992_v34 }
  0xf6   :  { %v1016_v32 = vpop.f32.mrf.mxu1  ;;  %v995_v38 = vadd.f32 %v994_v31, %v993_v29 }
  0xf7   :  { %v1017_v39 = vadd.f32 %v1016_v32, %v1015_v30 }
  0xf9   :  { %v679_v46 = vadd.f32 %v1017_v39, %v995_v38 }
 0x10f   :  { %v1034_v33 = vpop.f32.mrf.mxu0 }
 0x110   :  { %v1056_v36 = vpop.f32.mrf.mxu1 }
 0x111   :  { %v1035_v37 = vpop.f32.mrf.mxu0 }
 0x112   :  { %v1036_v40 = vadd.f32 %v1035_v37, %v1034_v33  ;;  %v1057_v41 = vpop.f32.mrf.mxu1 }
 0x113   :  { %v1037_v42 = vpop.f32.mrf.mxu0  ;;  %v1058_v50 = vadd.f32 %v1057_v41, %v1056_v36 }
 0x114   :  { %v1059_v44 = vpop.f32.mrf.mxu1  ;;  %v717_v47 = vadd.f32 %v1036_v40, %v676_v43 }
 0x115   :  { %v1038_v45 = vpop.f32.mrf.mxu0 }
 0x116   :  { %v1039_v48 = vadd.f32 %v1038_v45, %v1037_v42  ;;  %v1060_v49 = vpop.f32.mrf.mxu1  ;;  %v758_v53 = vadd.f32 %v1058_v50, %v717_v47 }
 0x117   :  { %v1061_v52 = vadd.f32 %v1060_v49, %v1059_v44 }
 0x118   :  { %v720_v51 = vadd.f32 %v1039_v48, %v679_v46 }
 0x11a   :  { %v761_v54 = vadd.f32 %v1061_v52, %v720_v51 }
 0x11c   :  { %v773_v55 = vpack.c.bf16 %v761_v54, %v758_v53 }
 0x11e   :  { %1088 = vmatmul.mubr.bf16.vlgmr.msra.gmra.mxu0 %v773_v55 }
 0x1de   :  { %v879_v57 = vpop.f32.mrf.mxu0 }
 0x1df   :  { %v880_v58 = vadd.f32 %v965_v56, %v879_v57 }
 0x1e0   :  { %v1089_v59 = vpop.f32.mrf.mxu0 }
 0x1e1   :  { %886 = vst [vmem:[%s1284_s4] sm:$0xff] %v880_v58 }
 0x1e2   :  { %v882_v60 = vpop.f32.mrf.mxu0 }
 0x1e3   :  { %v883_v61 = vadd.f32 %v965_v56, %v882_v60 }
 0x1e4   :  { %v1090_v62 = vpop.f32.mrf.mxu0 }
 0x1e5   :  { %887 = vst [vmem:[%s1284_s4 + $0x8] sm:$0xff] %v883_v61 }
 0x1e6   :  { %892 = vsyncpa [#allocation4], 1 }

</bundles_post_ra>
